<compile_context>
chip_gen: v7x
topology: tpu7x:2x2x1
jax: 0.10.0
libtpu: 0.0.40
codegen_flags: <defaults>
</compile_context>

<pallas_src>
import math
import jax
import jax.numpy as jnp
from jax.experimental import pallas as pl
from jax.experimental.pallas import tpu as pltpu

D_IN = 512
D_OUT = 512

# param-pack row layout (one (8,512) f32 array -> one DMA, stays VMEM-resident)
_ROW_BIAS, _ROW_A, _ROW_B, _ROW_MEAN = 0, 1, 2, 3


def _round_up(x, m):
    return ((x + m - 1) // m) * m


def _default_tm_max():
    """Per-generation row-tile cap.  v5e: small tiles (slow HBM, weak f32-only VPU);
    v6e/v7x: 2048 rows (~24 MiB double-buffered; ~2x headroom inside v7x 64 MiB VMEM)."""
    try:
        kind = jax.devices()[0].device_kind.lower().replace(" ", "")
    except Exception:
        return 1024
    if "v5lite" in kind or "v5e" in kind:
        return 512
    if "v6" in kind or "v7" in kind:
        return 2048
    return 1024


def _choose_tm(m, tm_max):
    """Row tile: multiple of 8 (sublane); for larger M pick >= 2 grid steps so the
    "parallel" grid axis shards across both v7x TensorCores.  Ragged final block is
    handled by Pallas masking (no pad / slice in the wrapper)."""
    m8 = _round_up(max(m, 8), 8)
    if m8 <= 256:
        return min(m8, _round_up(tm_max, 8))
    tm = min(tm_max, _round_up(pl.cdiv(m8, 2), 256))
    return max(8, min(tm, m8))


def _vmem_limit_bytes(tm, in_itemsize, p_itemsize):
    """Explicit scoped-VMEM budget: double-buffered I/O tiles + resident weight/params
    + margin, capped well under physical VMEM (64 MiB/TC on v7x, 128 MiB on v5e/v6e)."""
    tile = tm * D_IN * in_itemsize + tm * D_OUT * p_itemsize + tm * D_OUT * 4
    resident = D_IN * D_OUT * 2 + 8 * D_OUT * 4      # bf16 weight + packed params
    need = 2 * tile + 2 * resident + (2 << 20)
    try:
        phys = pltpu.get_tpu_info().vmem_capacity_bytes
    except Exception:
        phys = 64 << 20
    return int(min(max(need, 4 << 20), int(phys * 0.75)))


def _fused_latent_kernel(latent_ref, w_ref, params_ref, p_out_ref, w_out_ref):
    # MXU matmul: bf16 operands, f32 accumulation.  The gaussian affine is folded
    # into w_ref / the bias row, so the latent tile feeds the MXU directly.
    x = latent_ref[...].astype(jnp.bfloat16)          # no-op if the caller passes bf16
    p = jnp.dot(x, w_ref[...], preferred_element_type=jnp.float32)

    bias = params_ref[_ROW_BIAS:_ROW_BIAS + 1, :]      # (1, 512) sublane-broadcast rows
    a = params_ref[_ROW_A:_ROW_A + 1, :]
    b = params_ref[_ROW_B:_ROW_B + 1, :]
    mean = params_ref[_ROW_MEAN:_ROW_MEAN + 1, :]

    p = p + bias

    # Activate (single exp per element):
    #   mask = p > mean
    #   act  = where(mask, exp(a*(p-mean)) - 1, 1 - exp(-b*(p-mean)))
    # NOTE: matches the reference math exactly; for p << mean the lower branch's exp
    # can overflow just like the original module (no clamp added on purpose).
    d = p - mean
    mask = d > 0.0
    t = jnp.where(mask, a * d, -b * d)
    e = jnp.exp(t)
    act = jnp.where(mask, e - 1.0, 1.0 - e)

    # p_latent = final_linear(clip_latent) = Activate(EqualLinear(clip_latent))
    p_out_ref[...] = act.astype(p_out_ref.dtype)       # bf16 writeback (traffic cut)
    # w_latent = LeakyReLU(0.2)(p_latent).  Separate compare kept because a/b are
    # trainable and not guaranteed positive (mask-reuse would be unsafe then).
    w_out_ref[...] = jnp.where(act >= 0.0, act, 0.2 * act).astype(w_out_ref.dtype)


def prepare_fused_params(gauss_std, gauss_mean, eq_weight_scaled, eq_bias,
                         act_a, act_b, act_mean):
    """One-time host precompute (hoisted outside the MyOptim optimizer loop).

    eq_weight_scaled: (512, 512) f32, already (in, out) and scaled by (1/sqrt(in))*lr_mul.
    Returns (w_bf16 (512,512) bf16, params_packed (8,512) f32).
    """
    # Fold `latent * std + mean` into the linear layer:  (x*std) @ W + (mean @ W + b)
    w_folded = gauss_std.reshape(D_IN, 1) * eq_weight_scaled
    b_folded = gauss_mean @ eq_weight_scaled + eq_bias
    w_bf16 = w_folded.astype(jnp.bfloat16)

    params = jnp.zeros((8, D_OUT), jnp.float32)
    params = params.at[_ROW_BIAS, :].set(b_folded.reshape(-1))
    params = params.at[_ROW_A, :].set(act_a.reshape(-1))
    params = params.at[_ROW_B, :].set(act_b.reshape(-1))
    params = params.at[_ROW_MEAN, :].set(act_mean.reshape(-1))
    return w_bf16, params


def fused_latent_forward(latent_flat, w_bf16, params_packed, *, tm_max=None):
    """latent_flat: (M, 512) f32 or bf16.
    Returns (p_latent (M,512) bf16, w_latent (M,512) f32)."""
    M = latent_flat.shape[0]
    if tm_max is None:
        tm_max = _default_tm_max()
    tm = _choose_tm(M, tm_max)
    grid = (pl.cdiv(M, tm),)        # ragged final block masked by Pallas: no pad/slice

    vmem_limit = _vmem_limit_bytes(
        tm, jnp.dtype(latent_flat.dtype).itemsize, jnp.dtype(jnp.bfloat16).itemsize)

    row_spec = lambda: pl.BlockSpec((tm, D_OUT), lambda i: (i, 0))
    resident = lambda shape: pl.BlockSpec(shape, lambda i: (0, 0))   # stays in VMEM

    p_latent, w_latent = pl.pallas_call(
        _fused_latent_kernel,
        out_shape=(jax.ShapeDtypeStruct((M, D_OUT), jnp.bfloat16),   # p_latent (narrow)
                   jax.ShapeDtypeStruct((M, D_OUT), jnp.float32)),   # w_latent
        grid_spec=pltpu.PrefetchScalarGridSpec(
            num_scalar_prefetch=0,
            grid=grid,
            in_specs=[
                pl.BlockSpec((tm, D_IN), lambda i: (i, 0)),   # latent tile
                resident((D_IN, D_OUT)),                      # folded weight (bf16)
                resident((8, D_OUT)),                         # packed params (f32)
            ],
            out_specs=[row_spec(), row_spec()],
        ),
        compiler_params=pltpu.CompilerParams(
            dimension_semantics=("parallel",),
            vmem_limit_bytes=vmem_limit),
    )(latent_flat, w_bf16, params_packed)
    return p_latent, w_latent


if __name__ == "__main__":
    key = jax.random.PRNGKey(0)
    k_lat, k_w, k_std, k_mean, k_a, k_b, k_am = jax.random.split(key, 7)

    # Module shapes: latent is (batch, 18, 512); keep it small: batch=2.
    batch, n_latent = 2, 18
    latent = jax.random.normal(k_lat, (batch, n_latent, D_IN), jnp.float32)
    latent_flat = latent.reshape(batch * n_latent, D_IN)   # M = 36 (exercises ragged block)

    # gaussian_fit (synthetic, deterministic)
    gauss_std = 1.0 + 0.1 * jax.random.normal(k_std, (1, D_IN), jnp.float32)
    gauss_mean = 0.05 * jax.random.normal(k_mean, (1, D_IN), jnp.float32)

    # EqualLinear(512, 512, lr_mul=1): weight = randn(out,in)/lr_mul,
    # effective weight = weight * (1/sqrt(in)) * lr_mul, bias = zeros.
    lr_mul = 1.0
    scale = (1.0 / math.sqrt(D_IN)) * lr_mul
    eq_weight = jax.random.normal(k_w, (D_OUT, D_IN), jnp.float32) / lr_mul
    eq_weight_scaled = (eq_weight * scale).T             # (in, out) for x @ W
    eq_bias = jnp.zeros((1, D_OUT), jnp.float32)

    # Activate params (slightly perturbed around their init values).
    act_a = 1.0 + 0.1 * jax.random.normal(k_a, (1, D_OUT), jnp.float32)
    act_b = 1.0 + 0.1 * jax.random.normal(k_b, (1, D_OUT), jnp.float32)
    act_mean = 0.1 * jax.random.normal(k_am, (1, D_OUT), jnp.float32)

    # One-time precompute (hoisted outside the MyOptim optimizer loop).
    w_bf16, params_packed = prepare_fused_params(
        gauss_std, gauss_mean, eq_weight_scaled, eq_bias, act_a, act_b, act_mean)

    p_latent, w_latent = fused_latent_forward(latent_flat, w_bf16, params_packed)
    jax.block_until_ready((p_latent, w_latent))
    p_latent_f32 = p_latent.astype(jnp.float32)

    # --- Check 1: tight, against a pure-JAX reference of the exact fused math
    #     (bf16 MXU operands, f32 elementwise). ---
    b_folded = params_packed[_ROW_BIAS:_ROW_BIAS + 1, :]
    lin_bf = jnp.dot(latent_flat.astype(jnp.bfloat16), w_bf16,
                     preferred_element_type=jnp.float32) + b_folded
    d_bf = lin_bf - act_mean
    mask_bf = d_bf > 0.0
    e_bf = jnp.exp(jnp.where(mask_bf, act_a * d_bf, -act_b * d_bf))
    act_bf = jnp.where(mask_bf, e_bf - 1.0, 1.0 - e_bf)
    w_bf = jnp.where(act_bf >= 0.0, act_bf, 0.2 * act_bf)
    assert jnp.allclose(p_latent_f32, act_bf, atol=2e-2, rtol=1e-2)   # bf16 writeback
    assert jnp.allclose(w_latent, w_bf, atol=1e-3, rtol=1e-3)

    # --- Check 2: looser, against the original full-f32 module semantics
    #     (affine -> EqualLinear -> Activate -> LeakyReLU).  bf16 MXU + affine folding
    #     + bf16 p_latent writeback change rounding, hence wider tolerance. ---
    x_ref = latent_flat * gauss_std + gauss_mean
    lin_ref = x_ref @ eq_weight_scaled + eq_bias
    d_ref = lin_ref - act_mean
    p_ref = jnp.where(lin_ref > act_mean,
                      jnp.exp(act_a * d_ref) - 1.0,
                      -jnp.exp(-act_b * d_ref) + 1.0)     # p_latent = Activate output
    w_ref = jnp.where(p_ref >= 0, p_ref, 0.2 * p_ref)     # w_latent = LeakyReLU(p_latent)
    assert jnp.allclose(p_latent_f32, p_ref, atol=5e-2, rtol=5e-2)
    assert jnp.allclose(w_latent, w_ref, atol=5e-2, rtol=5e-2)

    print("KERNEL_OK")
</pallas_src>

<mosaic_0001>
module attributes {stable_mosaic.version = 11 : i64} {
  func.func @_fused_latent_kernel(%arg0: i32, %arg1: memref<40x512xf32, #tpu.memory_space<vmem>>, %arg2: memref<512x512xbf16, #tpu.memory_space<vmem>>, %arg3: memref<8x512xf32, #tpu.memory_space<vmem>>, %arg4: memref<40x512xbf16, #tpu.memory_space<vmem>>, %arg5: memref<40x512xf32, #tpu.memory_space<vmem>>) attributes {dimension_semantics = [#tpu.dimension_semantics<parallel>], iteration_bounds = array<i64: 1>, scalar_prefetch = 0 : i64, scratch_operands = 0 : i64, tpu.core_type = #tpu.core_type<tc>, window_params = [{transform_indices = @transform_0, window_bounds = array<i64: 40, 512>}, {pipeline_mode = #tpu.pipeline_mode<synchronous>, transform_indices = @transform_1, window_bounds = array<i64: 512, 512>}, {pipeline_mode = #tpu.pipeline_mode<synchronous>, transform_indices = @transform_2, window_bounds = array<i64: 8, 512>}, {transform_indices = @transform_3, window_bounds = array<i64: 40, 512>}, {transform_indices = @transform_4, window_bounds = array<i64: 40, 512>}]} {
    %c0 = arith.constant 0 : index
    %c0_0 = arith.constant 0 : index
    %0 = vector.load %arg1[%c0, %c0_0] : memref<40x512xf32, #tpu.memory_space<vmem>>, vector<40x512xf32>
    %1 = arith.truncf %0 : vector<40x512xf32> to vector<40x512xbf16>
    %c0_1 = arith.constant 0 : index
    %c0_2 = arith.constant 0 : index
    %2 = vector.load %arg2[%c0_1, %c0_2] : memref<512x512xbf16, #tpu.memory_space<vmem>>, vector<512x512xbf16>
    %cst = arith.constant dense<0.000000e+00> : vector<40x512xf32>
    %3 = tpu.matmul %1, %2, %cst {dimension_numbers = #tpu.dot_dimension_numbers<[1], [0], [0], [1], [0, 0, 1, 1], [], []>} : vector<40x512xbf16>, vector<512x512xbf16>, vector<40x512xf32> -> vector<40x512xf32>
    %c0_3 = arith.constant 0 : index
    %c0_4 = arith.constant 0 : index
    %4 = vector.load %arg3[%c0_3, %c0_4] : memref<8x512xf32, #tpu.memory_space<vmem>>, vector<1x512xf32>
    %c1 = arith.constant 1 : index
    %c0_5 = arith.constant 0 : index
    %5 = vector.load %arg3[%c1, %c0_5] : memref<8x512xf32, #tpu.memory_space<vmem>>, vector<1x512xf32>
    %c2 = arith.constant 2 : index
    %c0_6 = arith.constant 0 : index
    %6 = vector.load %arg3[%c2, %c0_6] : memref<8x512xf32, #tpu.memory_space<vmem>>, vector<1x512xf32>
    %c3 = arith.constant 3 : index
    %c0_7 = arith.constant 0 : index
    %7 = vector.load %arg3[%c3, %c0_7] : memref<8x512xf32, #tpu.memory_space<vmem>>, vector<1x512xf32>
    %8 = vector.broadcast %4 : vector<1x512xf32> to vector<40x512xf32>
    %9 = arith.addf %3, %8 : vector<40x512xf32>
    %10 = vector.broadcast %7 : vector<1x512xf32> to vector<40x512xf32>
    %11 = arith.subf %9, %10 : vector<40x512xf32>
    %cst_8 = arith.constant 0.000000e+00 : f32
    %12 = vector.broadcast %cst_8 : f32 to vector<40x512xf32>
    %13 = arith.cmpf ogt, %11, %12 : vector<40x512xf32>
    %14 = vector.broadcast %5 : vector<1x512xf32> to vector<40x512xf32>
    %15 = arith.mulf %14, %11 : vector<40x512xf32>
    %cst_9 = arith.constant 0.000000e+00 : f32
    %16 = vector.broadcast %cst_9 : f32 to vector<1x512xf32>
    %17 = arith.subf %16, %6 : vector<1x512xf32>
    %18 = vector.broadcast %17 : vector<1x512xf32> to vector<40x512xf32>
    %19 = arith.mulf %18, %11 : vector<40x512xf32>
    %20 = arith.select %13, %15, %19 : vector<40x512xi1>, vector<40x512xf32>
    %21 = math.exp %20 : vector<40x512xf32>
    %cst_10 = arith.constant 1.000000e+00 : f32
    %22 = vector.broadcast %cst_10 : f32 to vector<40x512xf32>
    %23 = arith.subf %21, %22 : vector<40x512xf32>
    %cst_11 = arith.constant 1.000000e+00 : f32
    %24 = vector.broadcast %cst_11 : f32 to vector<40x512xf32>
    %25 = arith.subf %24, %21 : vector<40x512xf32>
    %26 = arith.select %13, %23, %25 : vector<40x512xi1>, vector<40x512xf32>
    %27 = arith.truncf %26 : vector<40x512xf32> to vector<40x512xbf16>
    %c0_12 = arith.constant 0 : index
    %c0_13 = arith.constant 0 : index
    %28 = vector.load %arg4[%c0_12, %c0_13] : memref<40x512xbf16, #tpu.memory_space<vmem>>, vector<40x512xbf16>
    tpu.vector_store %arg4[%c0_12, %c0_13], %27 {strides = array<i32>} : memref<40x512xbf16, #tpu.memory_space<vmem>>, vector<40x512xbf16>,
    %cst_14 = arith.constant 0.000000e+00 : f32
    %29 = vector.broadcast %cst_14 : f32 to vector<40x512xf32>
    %30 = arith.cmpf oge, %26, %29 : vector<40x512xf32>
    %cst_15 = arith.constant 2.000000e-01 : f32
    %31 = vector.broadcast %cst_15 : f32 to vector<40x512xf32>
    %32 = arith.mulf %31, %26 : vector<40x512xf32>
    %33 = arith.select %30, %26, %32 : vector<40x512xi1>, vector<40x512xf32>
    %c0_16 = arith.constant 0 : index
    %c0_17 = arith.constant 0 : index
    %34 = vector.load %arg5[%c0_16, %c0_17] : memref<40x512xf32, #tpu.memory_space<vmem>>, vector<40x512xf32>
    tpu.vector_store %arg5[%c0_16, %c0_17], %33 {strides = array<i32>} : memref<40x512xf32, #tpu.memory_space<vmem>>, vector<40x512xf32>,
    return
  }
  func.func @transform_0(%arg0: i32) -> (i32, i32) {
    %c0_i32 = arith.constant 0 : i32
    %c0_i32_0 = arith.constant 0 : i32
    return %arg0, %c0_i32 : i32, i32
  }
  func.func @transform_1(%arg0: i32) -> (i32, i32) {
    %c0_i32 = arith.constant 0 : i32
    %c0_i32_0 = arith.constant 0 : i32
    %c0_i32_1 = arith.constant 0 : i32
    return %c0_i32, %c0_i32_0 : i32, i32
  }
  func.func @transform_2(%arg0: i32) -> (i32, i32) {
    %c0_i32 = arith.constant 0 : i32
    %c0_i32_0 = arith.constant 0 : i32
    %c0_i32_1 = arith.constant 0 : i32
    return %c0_i32, %c0_i32_0 : i32, i32
  }
  func.func @transform_3(%arg0: i32) -> (i32, i32) {
    %c0_i32 = arith.constant 0 : i32
    %c0_i32_0 = arith.constant 0 : i32
    return %arg0, %c0_i32 : i32, i32
  }
  func.func @transform_4(%arg0: i32) -> (i32, i32) {
    %c0_i32 = arith.constant 0 : i32
    %c0_i32_0 = arith.constant 0 : i32
    return %arg0, %c0_i32 : i32, i32
  }
}

</mosaic_0001>

<bundles_post_ra>
// kernel: tpu_custom_call.1
= control target key start
LH: loop header
LB: loop body
LE: loop exit
PB: predicated region body
PF: predicated region fallthrough
CT: control target
= control target key end

     0   :  { %10 = vsyncpa [#allocation3], 0  ;;  %s2584_s0 = inlined_call_operand.hbm [shape: f32[36,512], index: 0, kind: input, shape index: {}]   ;;  %s2585_s1 = inlined_call_operand.hbm [shape: bf16[512,512], index: 1, kind: input, shape index: {}]   ;;  %s2586_s2 = inlined_call_operand.hbm [shape: f32[8,512], index: 2, kind: input, shape index: {}]   ;;  %s2587_s3 = inlined_call_operand.hbm [shape: bf16[36,512], index: 3, kind: output, shape index: {0}]   ;;  %s2588_s4 = inlined_call_operand.hbm [shape: f32[36,512], index: 4, kind: output, shape index: {1}]  }
   0x1   :  { %11 = vsyncpa [#allocation6], 0 }
   0x2   :  { %12 = vsyncpa [#allocation4], 0 }
   0x3   :  { %13 = vsyncpa [#allocation10], 0  ;;  %s2152_s15 = smov [#allocation5]   ;;  %s2034_s19 = scalar_lea.hbm %s2585_s1, 16384 }
   0x4   :  { %s31_s16 = sshll.u32 %s2152_s15, 4  ;;  %p2035_p0 = scmp.ne.s32.totalorder %s2585_s1, %s2034_s19  ;;  %s32_s16 = int_to_ptr.vmem [resolvable:$true] %s31_s16 }
   0x5   :  { %p2038_p1 = scmp.lt.u32.totalorder %s2034_s19, %s2585_s1 }
   0x7   :  { %p2040_p2 = pnand %p2038_p1, %p2035_p0 }
   0x9   :  { %2043 = shalt.err (!%p2040_p2)
}
   0xa   :  { %s2044_s24 = scalar_lea.vmem %s32_s16, 16384  ;;  %p2049_p4 = scmp.lt.s32.totalorder %s32_s16, %s32_s16 }
   0xb   :  { %p2045_p3 = scmp.ne.s32.totalorder %s32_s16, %s2044_s24  ;;  %p2050_p5 = scmp.lt.s32.totalorder %s2044_s24, %s2044_s24 }
   0xd   :  { %p2051_p6 = por %p2050_p5, %p2049_p4 }
   0xf   :  { %p2052_p7 = pnand %p2051_p6, %p2045_p3 }
  0x11   :  { %2055 = shalt.err (!%p2052_p7)
}
  0x12   :  { %s2153_s25 = smov 256   ;;  %s2154_s26 = smov 16  }
  0x13   :  { %37 = dma.hbm_to_vmem [thread:$0]  %s2585_s1, 16384, %s32_s16, [#allocation6], %s2153_s25, %s2153_s25, %s2154_s26  }
  0x14   :  { %s2155_s29 = smov [#allocation2]   ;;  %s2056_s7 = scalar_lea.hbm %s2584_s0, 2560 }
  0x15   :  { %s19_s30 = sshll.u32 %s2155_s29, 4  ;;  %p2057_p8 = scmp.ne.s32.totalorder %s2584_s0, %s2056_s7  ;;  %s20_s30 = int_to_ptr.vmem [resolvable:$true] %s19_s30 }
  0x16   :  { %p2060_p9 = scmp.lt.u32.totalorder %s2056_s7, %s2584_s0 }
  0x18   :  { %p2062_p10 = pnand %p2060_p9, %p2057_p8 }
  0x1a   :  { %2065 = shalt.err (!%p2062_p10)
}
  0x1b   :  { %s2066_s12 = scalar_lea.vmem %s20_s30, 2560  ;;  %p2071_p12 = scmp.lt.s32.totalorder %s20_s30, %s20_s30 }
  0x1c   :  { %p2067_p11 = scmp.ne.s32.totalorder %s20_s30, %s2066_s12  ;;  %p2072_p13 = scmp.lt.s32.totalorder %s2066_s12, %s2066_s12 }
  0x1e   :  { %p2073_p0 = por %p2072_p13, %p2071_p12 }
  0x20   :  { %p2074_p1 = pnand %p2073_p0, %p2067_p11 }
  0x22   :  { %2077 = shalt.err (!%p2074_p1)
}
  0x23   :  { %s2156_s1 = smov 512   ;;  %s2157_s13 = smov 32  }
  0x24   :  { %25 = dma.hbm_to_vmem [thread:$0]  %s2584_s0, 2560, %s20_s30, [#allocation3], %s2156_s1, %s2156_s1, %s2157_s13  }
  0x25   :  { %s2158_s16 = smov [#allocation7]   ;;  %s2078_s20 = scalar_lea.hbm %s2586_s2, 512 }
  0x26   :  { %s44_s17 = sshll.u32 %s2158_s16, 4  ;;  %p2079_p2 = scmp.ne.s32.totalorder %s2586_s2, %s2078_s20  ;;  %s45_s17 = int_to_ptr.vmem [resolvable:$true] %s44_s17 }
  0x27   :  { %p2082_p3 = scmp.lt.u32.totalorder %s2078_s20, %s2586_s2 }
  0x29   :  { %p2084_p4 = pnand %p2082_p3, %p2079_p2 }
  0x2b   :  { %2087 = shalt.err (!%p2084_p4)
}
  0x2c   :  { %s2088_s27 = scalar_lea.vmem %s45_s17, 512  ;;  %p2093_p6 = scmp.lt.s32.totalorder %s45_s17, %s45_s17 }
  0x2d   :  { %p2089_p5 = scmp.ne.s32.totalorder %s45_s17, %s2088_s27  ;;  %p2094_p7 = scmp.lt.s32.totalorder %s2088_s27, %s2088_s27 }
  0x2f   :  { %p2095_p8 = por %p2094_p7, %p2093_p6 }
  0x31   :  { %p2096_p9 = pnand %p2095_p8, %p2089_p5 }
  0x33   :  { %2099 = shalt.err (!%p2096_p9)
}
  0x34   :  { %47 = dma.hbm_to_vmem [thread:$0]  %s2586_s2, 512, %s45_s17, [#allocation6]  }
  0x35   :  { %2144 = dma.done.wait [#allocation3], 2560  }
  0x36   :  { %2145 = vsyncadd [#allocation3], 4294964736 }
  0x37   :  { %2146 = dma.done.wait [#allocation6], 16896  }
  0x38   :  { %2147 = vsyncadd [#allocation6], 4294950400  ;;  %v1802_v0 = vld [vmem:[#allocation5 + $0x4] ss:$16 sps:$4 sm:$0xff]   ;;  %v1804_v1 = vld [vmem:[#allocation5 + $0xc] ss:$16 sps:$4 sm:$0xff]  }
  0x39   :  { %885 = vmatprep.subr.bf16.mxu0 %v1802_v0  ;;  %v1806_v2 = vld [vmem:[#allocation5] ss:$16 sps:$4 sm:$0xff]   ;;  %v1807_v3 = vld [vmem:[#allocation5 + $0x8] ss:$16 sps:$4 sm:$0xff]   ;;  %1007 = vmatprep.subr.bf16.mxu1 %v1804_v1  ;;  %v1808_v4 = vld [vmem:[#allocation5 + $0x24] ss:$16 sps:$4 sm:$0xff]  }
  0x3a   :  { %886 = vmatpush1.bf16.msra.mxu0 %v1806_v2  ;;  %1008 = vmatpush1.bf16.msra.mxu1 %v1807_v3  ;;  %v1810_v5 = vld [vmem:[#allocation5 + $0x2c] ss:$16 sps:$4 sm:$0xff]   ;;  %v1812_v6 = vld [vmem:[#allocation5 + $0x20] ss:$16 sps:$4 sm:$0xff]   ;;  %v1813_v7 = vld [vmem:[#allocation5 + $0x28] ss:$16 sps:$4 sm:$0xff]  }
  0x3b   :  { %887 = vmatprep.subr.bf16.mxu0 %v1808_v4  ;;  %1009 = vmatprep.subr.bf16.mxu1 %v1810_v5  ;;  %v1814_v8 = vld [vmem:[#allocation5 + $0x44] ss:$16 sps:$4 sm:$0xff]   ;;  %v1816_v9 = vld [vmem:[#allocation5 + $0x4c] ss:$16 sps:$4 sm:$0xff]   ;;  %v1818_v10 = vld [vmem:[#allocation5 + $0x40] ss:$16 sps:$4 sm:$0xff]  }
  0x3c   :  { %v1819_v11 = vld [vmem:[#allocation5 + $0x48] ss:$16 sps:$4 sm:$0xff]   ;;  %v1820_v12 = vld [vmem:[#allocation5 + $0x64] ss:$16 sps:$4 sm:$0xff]   ;;  %v1822_v13 = vld [vmem:[#allocation5 + $0x6c] ss:$16 sps:$4 sm:$0xff]  }
  0x3d   :  { %v1824_v14 = vld [vmem:[#allocation5 + $0x60] ss:$16 sps:$4 sm:$0xff]   ;;  %v1825_v15 = vld [vmem:[#allocation5 + $0x68] ss:$16 sps:$4 sm:$0xff]   ;;  %v1826_v16 = vld [vmem:[#allocation5 + $0x84] ss:$16 sps:$4 sm:$0xff]  }
  0x3e   :  { %888 = vmatpush1.bf16.msra.mxu0 %v1812_v6  ;;  %1010 = vmatpush1.bf16.msra.mxu1 %v1813_v7  ;;  %v1828_v17 = vld [vmem:[#allocation5 + $0x8c] ss:$16 sps:$4 sm:$0xff]   ;;  %v1830_v18 = vld [vmem:[#allocation5 + $0x80] ss:$16 sps:$4 sm:$0xff]   ;;  %v1831_v19 = vld [vmem:[#allocation5 + $0x88] ss:$16 sps:$4 sm:$0xff]  }
  0x3f   :  { %889 = vmatprep.subr.bf16.mxu0 %v1814_v8  ;;  %1011 = vmatprep.subr.bf16.mxu1 %v1816_v9  ;;  %v1832_v20 = vld [vmem:[#allocation5 + $0xa4] ss:$16 sps:$4 sm:$0xff]   ;;  %v1834_v21 = vld [vmem:[#allocation5 + $0xac] ss:$16 sps:$4 sm:$0xff]   ;;  %v1836_v22 = vld [vmem:[#allocation5 + $0xa0] ss:$16 sps:$4 sm:$0xff]  }
  0x40   :  { %v1837_v23 = vld [vmem:[#allocation5 + $0xa8] ss:$16 sps:$4 sm:$0xff]   ;;  %v1838_v24 = vld [vmem:[#allocation5 + $0xc4] ss:$16 sps:$4 sm:$0xff]   ;;  %v1840_v25 = vld [vmem:[#allocation5 + $0xcc] ss:$16 sps:$4 sm:$0xff]  }
  0x41   :  { %v1842_v26 = vld [vmem:[#allocation5 + $0xc0] ss:$16 sps:$4 sm:$0xff]   ;;  %v1843_v27 = vld [vmem:[#allocation5 + $0xc8] ss:$16 sps:$4 sm:$0xff]   ;;  %v1844_v28 = vld [vmem:[#allocation5 + $0xe4] ss:$16 sps:$4 sm:$0xff]  }
  0x42   :  { %890 = vmatpush1.bf16.msra.mxu0 %v1818_v10  ;;  %1012 = vmatpush1.bf16.msra.mxu1 %v1819_v11  ;;  %v1846_v29 = vld [vmem:[#allocation5 + $0xec] ss:$16 sps:$4 sm:$0xff]   ;;  %v1848_v30 = vld [vmem:[#allocation5 + $0xe0] ss:$16 sps:$4 sm:$0xff]   ;;  %v1849_v31 = vld [vmem:[#allocation5 + $0xe8] ss:$16 sps:$4 sm:$0xff]  }
  0x43   :  { %891 = vmatprep.subr.bf16.mxu0 %v1820_v12  ;;  %1013 = vmatprep.subr.bf16.mxu1 %v1822_v13  ;;  %v1850_v32 = vld [vmem:[#allocation5 + $0x104] ss:$16 sps:$4 sm:$0xff]   ;;  %v1852_v33 = vld [vmem:[#allocation5 + $0x10c] ss:$16 sps:$4 sm:$0xff]   ;;  %v1854_v34 = vld [vmem:[#allocation5 + $0x100] ss:$16 sps:$4 sm:$0xff]  }
  0x44   :  { %v1855_v35 = vld [vmem:[#allocation5 + $0x108] ss:$16 sps:$4 sm:$0xff]   ;;  %v1856_v36 = vld [vmem:[#allocation5 + $0x124] ss:$16 sps:$4 sm:$0xff]   ;;  %v1858_v37 = vld [vmem:[#allocation5 + $0x12c] ss:$16 sps:$4 sm:$0xff]  }
  0x45   :  { %v1860_v38 = vld [vmem:[#allocation5 + $0x120] ss:$16 sps:$4 sm:$0xff]   ;;  %v1861_v39 = vld [vmem:[#allocation5 + $0x128] ss:$16 sps:$4 sm:$0xff]   ;;  %v1862_v40 = vld [vmem:[#allocation5 + $0x144] ss:$16 sps:$4 sm:$0xff]  }
  0x46   :  { %892 = vmatpush1.bf16.msra.mxu0 %v1824_v14  ;;  %1014 = vmatpush1.bf16.msra.mxu1 %v1825_v15  ;;  %v1864_v41 = vld [vmem:[#allocation5 + $0x14c] ss:$16 sps:$4 sm:$0xff]   ;;  %v1866_v42 = vld [vmem:[#allocation5 + $0x140] ss:$16 sps:$4 sm:$0xff]   ;;  %v1867_v43 = vld [vmem:[#allocation5 + $0x148] ss:$16 sps:$4 sm:$0xff]  }
  0x47   :  { %893 = vmatprep.subr.bf16.mxu0 %v1826_v16  ;;  %1015 = vmatprep.subr.bf16.mxu1 %v1828_v17  ;;  %v1868_v44 = vld [vmem:[#allocation5 + $0x164] ss:$16 sps:$4 sm:$0xff]   ;;  %v1870_v45 = vld [vmem:[#allocation5 + $0x16c] ss:$16 sps:$4 sm:$0xff]   ;;  %v1872_v48 = vld [vmem:[#allocation5 + $0x160] ss:$16 sps:$4 sm:$0xff]  }
  0x48   :  { %v58_v46 = vld [vmem:[#allocation2 + $0x8] sm:$0xff]  ;;  %v1874_v51 = vld [vmem:[#allocation5 + $0x184] ss:$16 sps:$4 sm:$0xff]   ;;  %v1878_v53 = vld [vmem:[#allocation5 + $0x180] ss:$16 sps:$4 sm:$0xff]   ;;  %s2159_s2 = smov [#allocation8]  }
  0x49   :  { %v62_v47 = vld [vmem:[#allocation2 + $0x28] sm:$0xff]  ;;  %v1880_v55 = vld [vmem:[#allocation5 + $0x1a4] ss:$16 sps:$4 sm:$0xff]   ;;  %v1884_v57 = vld [vmem:[#allocation5 + $0x1a0] ss:$16 sps:$4 sm:$0xff]   ;;  %s1552_s29 = sshll.u32 %s2159_s2, 4  ;;  %s1553_s29 = int_to_ptr.vmem [resolvable:$true] %s1552_s29 }
  0x4a   :  { %894 = vmatpush1.bf16.msra.mxu0 %v1830_v18  ;;  %1016 = vmatpush1.bf16.msra.mxu1 %v1831_v19  ;;  %v1873_v49 = vld [vmem:[#allocation5 + $0x168] ss:$16 sps:$4 sm:$0xff]   ;;  %v78_v50 = vpack.c.bf16 %v62_v47, %v58_v46  ;;  %v1876_v52 = vld [vmem:[#allocation5 + $0x18c] ss:$16 sps:$4 sm:$0xff]   ;;  %v1886_v59 = vld [vmem:[#allocation5 + $0x1c4] ss:$16 sps:$4 sm:$0xff]   ;;  %p2105_p11 = scmp.lt.s32.totalorder %s1553_s29, %s1553_s29 }
  0x4b   :  { %895 = vmatprep.subr.bf16.mxu0 %v1832_v20  ;;  %1017 = vmatprep.subr.bf16.mxu1 %v1834_v21  ;;  %v1879_v54 = vld [vmem:[#allocation5 + $0x188] ss:$16 sps:$4 sm:$0xff]   ;;  %v1882_v56 = vld [vmem:[#allocation5 + $0x1ac] ss:$16 sps:$4 sm:$0xff]   ;;  %v1890_v61 = vld [vmem:[#allocation5 + $0x1c0] ss:$16 sps:$4 sm:$0xff]  }
  0x4c   :  { %917 = vmatprep.mubr.bf16.mxu0 %v78_v50  ;;  %1039 = vmatprep.mubr.bf16.mxu1 %v78_v50  ;;  %v1885_v58 = vld [vmem:[#allocation5 + $0x1a8] ss:$16 sps:$4 sm:$0xff]   ;;  %v1888_v60 = vld [vmem:[#allocation5 + $0x1cc] ss:$16 sps:$4 sm:$0xff]   ;;  %v1892_v63 = vld [vmem:[#allocation5 + $0x1e4] ss:$16 sps:$4 sm:$0xff]  }
  0x4d   :  { %v1891_v62 = vld [vmem:[#allocation5 + $0x1c8] ss:$16 sps:$4 sm:$0xff]   ;;  %v1894_v0 = vld [vmem:[#allocation5 + $0x1ec] ss:$16 sps:$4 sm:$0xff]   ;;  %v1896_v1 = vld [vmem:[#allocation5 + $0x1e0] ss:$16 sps:$4 sm:$0xff]  }
  0x4e   :  { %896 = vmatpush1.bf16.msra.mxu0 %v1836_v22  ;;  %1018 = vmatpush1.bf16.msra.mxu1 %v1837_v23  ;;  %v1897_v2 = vld [vmem:[#allocation5 + $0x1e8] ss:$16 sps:$4 sm:$0xff]   ;;  %v1900_v3 = vld [vmem:[#allocation5 + $0x204] ss:$16 sps:$4 sm:$0xff]   ;;  %v1903_v6 = vld [vmem:[#allocation5 + $0x20c] ss:$16 sps:$4 sm:$0xff]  }
  0x4f   :  { %897 = vmatprep.subr.bf16.mxu0 %v1838_v24  ;;  %1019 = vmatprep.subr.bf16.mxu1 %v1840_v25  ;;  %v57_v4 = vld [vmem:[#allocation2] sm:$0xff]  ;;  %v1901_v8 = vld [vmem:[#allocation5 + $0x208] ss:$16 sps:$4 sm:$0xff]   ;;  %v1909_v11 = vld [vmem:[#allocation5 + $0x22c] ss:$16 sps:$4 sm:$0xff]   ;;  %s2160_s30 = smov [#allocation9]  }
  0x50   :  { %v61_v5 = vld [vmem:[#allocation2 + $0x20] sm:$0xff]  ;;  %v1907_v13 = vld [vmem:[#allocation5 + $0x228] ss:$16 sps:$4 sm:$0xff]   ;;  %v1915_v15 = vld [vmem:[#allocation5 + $0x24c] ss:$16 sps:$4 sm:$0xff]   ;;  %s1564_s5 = sshll.u32 %s2160_s30, 4  ;;  %s2547_s5 = int_to_ptr.vmem [resolvable:$true] %s1564_s5 }
  0x51   :  { %v1898_v7 = vld [vmem:[#allocation5 + $0x200] ss:$16 sps:$4 sm:$0xff]   ;;  %v77_v9 = vpack.c.bf16 %v61_v5, %v57_v4  ;;  %v1906_v10 = vld [vmem:[#allocation5 + $0x224] ss:$16 sps:$4 sm:$0xff]   ;;  %v1913_v17 = vld [vmem:[#allocation5 + $0x248] ss:$16 sps:$4 sm:$0xff]  }
  0x52   :  { %898 = vmatpush1.bf16.msra.mxu0 %v1842_v26  ;;  %1020 = vmatpush1.bf16.msra.mxu1 %v1843_v27  ;;  %v1904_v12 = vld [vmem:[#allocation5 + $0x220] ss:$16 sps:$4 sm:$0xff]   ;;  %v1912_v14 = vld [vmem:[#allocation5 + $0x244] ss:$16 sps:$4 sm:$0xff]   ;;  %v1921_v19 = vld [vmem:[#allocation5 + $0x26c] ss:$16 sps:$4 sm:$0xff]  }
  0x53   :  { %899 = vmatprep.subr.bf16.mxu0 %v1844_v28  ;;  %1021 = vmatprep.subr.bf16.mxu1 %v1846_v29  ;;  %v1910_v16 = vld [vmem:[#allocation5 + $0x240] ss:$16 sps:$4 sm:$0xff]   ;;  %v1918_v18 = vld [vmem:[#allocation5 + $0x264] ss:$16 sps:$4 sm:$0xff]   ;;  %v1919_v21 = vld [vmem:[#allocation5 + $0x268] ss:$16 sps:$4 sm:$0xff]  }
  0x54   :  { %v1916_v20 = vld [vmem:[#allocation5 + $0x260] ss:$16 sps:$4 sm:$0xff]   ;;  %v1924_v22 = vld [vmem:[#allocation5 + $0x284] ss:$16 sps:$4 sm:$0xff]   ;;  %v1927_v23 = vld [vmem:[#allocation5 + $0x28c] ss:$16 sps:$4 sm:$0xff]  }
  0x55   :  { %v66_v24 = vld [vmem:[#allocation2 + $0x48] sm:$0xff]  ;;  %v65_v26 = vld [vmem:[#allocation2 + $0x40] sm:$0xff]  ;;  %v64_v47 = vld [vmem:[#allocation2 + $0x38] sm:$0xff]  ;;  %s2100_s6 = scalar_lea.vmem %s1553_s29, 1280 }
  0x56   :  { %900 = vmatpush1.bf16.msra.mxu0 %v1848_v30  ;;  %1022 = vmatpush1.bf16.msra.mxu1 %v1849_v31  ;;  %v70_v25 = vld [vmem:[#allocation2 + $0x68] sm:$0xff]  ;;  %v69_v28 = vld [vmem:[#allocation2 + $0x60] sm:$0xff]  ;;  %p2101_p10 = scmp.ne.s32.totalorder %s1553_s29, %s2100_s6  ;;  %p2106_p12 = scmp.lt.s32.totalorder %s2100_s6, %s2100_s6 }
  0x57   :  { %901 = vmatprep.subr.bf16.mxu0 %v1850_v32  ;;  %1023 = vmatprep.subr.bf16.mxu1 %v1852_v33  ;;  %v82_v27 = vpack.c.bf16 %v70_v25, %v66_v24  ;;  %v81_v29 = vpack.c.bf16 %v69_v28, %v65_v26  ;;  %v1922_v30 = vld [vmem:[#allocation5 + $0x280] ss:$16 sps:$4 sm:$0xff]   ;;  %v1925_v31 = vld [vmem:[#allocation5 + $0x288] ss:$16 sps:$4 sm:$0xff]   ;;  %v1930_v32 = vld [vmem:[#allocation5 + $0x2a4] ss:$16 sps:$4 sm:$0xff]  }
  0x58   :  { %v1933_v33 = vld [vmem:[#allocation5 + $0x2ac] ss:$16 sps:$4 sm:$0xff]   ;;  %v1943_v50 = vld [vmem:[#allocation5 + $0x2e8] ss:$16 sps:$4 sm:$0xff]   ;;  %v1970_v5 = vld [vmem:[#allocation5 + $0x380] ss:$16 sps:$4 sm:$0xff]   ;;  %p2107_p13 = por %p2106_p12, %p2105_p11 }
  0x59   :  { %v1945_v46 = vld [vmem:[#allocation5 + $0x2ec] ss:$16 sps:$4 sm:$0xff]   ;;  %v67_v25 = vld [vmem:[#allocation2 + $0x50] sm:$0xff] }
  0x5a   :  { %902 = vmatpush1.bf16.msra.mxu0 %v1854_v34  ;;  %1024 = vmatpush1.bf16.msra.mxu1 %v1855_v35  ;;  %v74_v34 = vld [vmem:[#allocation2 + $0x88] sm:$0xff]  ;;  %v71_v26 = vld [vmem:[#allocation2 + $0x70] sm:$0xff]  ;;  %p2108_p0 = pnand %p2107_p13, %p2101_p10 }
  0x5b   :  { %903 = vmatprep.subr.bf16.mxu0 %v1856_v36  ;;  %1025 = vmatprep.subr.bf16.mxu1 %v1858_v37  ;;  %v86_v35 = vpack.c.bf16 %v74_v34, %v74_v34  ;;  %v73_v36 = vld [vmem:[#allocation2 + $0x80] sm:$0xff]  ;;  %v1975_v4 = vld [vmem:[#allocation5 + $0x38c] ss:$16 sps:$4 sm:$0xff]   ;;  %v83_v28 = vpack.c.bf16 %v71_v26, %v67_v25 }
  0x5c   :  { %v1928_v37 = vld [vmem:[#allocation5 + $0x2a0] ss:$16 sps:$4 sm:$0xff]  }
  0x5d   :  { %v221_v34 = vld [vmem:[#allocation7 + $0x2] ss:$8 sm:$0xf] }
  0x5e   :  { %904 = vmatpush1.bf16.msra.mxu0 %v1860_v38  ;;  %1026 = vmatpush1.bf16.msra.mxu1 %v1861_v39  ;;  %v1931_v38 = vld [vmem:[#allocation5 + $0x2a8] ss:$16 sps:$4 sm:$0xff]   ;;  %v1936_v39 = vld [vmem:[#allocation5 + $0x2c4] ss:$16 sps:$4 sm:$0xff]  }
  0x5f   :  { %905 = vmatprep.subr.bf16.mxu0 %v1862_v40  ;;  %1027 = vmatprep.subr.bf16.mxu1 %v1864_v41  ;;  %v1939_v40 = vld [vmem:[#allocation5 + $0x2cc] ss:$16 sps:$4 sm:$0xff]   ;;  %v85_v41 = vpack.c.bf16 %v73_v36, %v73_v36 }
  0x62   :  { %906 = vmatpush1.bf16.msra.mxu0 %v1866_v42  ;;  %1028 = vmatpush1.bf16.msra.mxu1 %v1867_v43  ;;  %v1934_v42 = vld [vmem:[#allocation5 + $0x2c0] ss:$16 sps:$4 sm:$0xff]   ;;  %v1937_v43 = vld [vmem:[#allocation5 + $0x2c8] ss:$16 sps:$4 sm:$0xff]  }
  0x63   :  { %907 = vmatprep.subr.bf16.mxu0 %v1868_v44  ;;  %1029 = vmatprep.subr.bf16.mxu1 %v1870_v45  ;;  %v60_v44 = vld [vmem:[#allocation2 + $0x18] sm:$0xff]  ;;  %v1942_v45 = vld [vmem:[#allocation5 + $0x2e4] ss:$16 sps:$4 sm:$0xff]  }
  0x66   :  { %908 = vmatpush1.bf16.msra.mxu0 %v1872_v48  ;;  %1030 = vmatpush1.bf16.msra.mxu1 %v1873_v49  ;;  %v80_v48 = vpack.c.bf16 %v64_v47, %v60_v44  ;;  %v1940_v49 = vld [vmem:[#allocation5 + $0x2e0] ss:$16 sps:$4 sm:$0xff]  }
  0x67   :  { %909 = vmatprep.subr.bf16.mxu0 %v1874_v51  ;;  %1031 = vmatprep.subr.bf16.mxu1 %v1876_v52  ;;  %v1948_v51 = vld [vmem:[#allocation5 + $0x304] ss:$16 sps:$4 sm:$0xff]   ;;  %v1951_v52 = vld [vmem:[#allocation5 + $0x30c] ss:$16 sps:$4 sm:$0xff]  }
  0x6a   :  { %910 = vmatpush1.bf16.msra.mxu0 %v1878_v53  ;;  %1032 = vmatpush1.bf16.msra.mxu1 %v1879_v54  ;;  %v1946_v53 = vld [vmem:[#allocation5 + $0x300] ss:$16 sps:$4 sm:$0xff]   ;;  %v1949_v54 = vld [vmem:[#allocation5 + $0x308] ss:$16 sps:$4 sm:$0xff]  }
  0x6b   :  { %911 = vmatprep.subr.bf16.mxu0 %v1880_v55  ;;  %1033 = vmatprep.subr.bf16.mxu1 %v1882_v56  ;;  %v1954_v55 = vld [vmem:[#allocation5 + $0x324] ss:$16 sps:$4 sm:$0xff]   ;;  %v1957_v56 = vld [vmem:[#allocation5 + $0x32c] ss:$16 sps:$4 sm:$0xff]  }
  0x6e   :  { %912 = vmatpush1.bf16.msra.mxu0 %v1884_v57  ;;  %1034 = vmatpush1.bf16.msra.mxu1 %v1885_v58  ;;  %v1952_v57 = vld [vmem:[#allocation5 + $0x320] ss:$16 sps:$4 sm:$0xff]   ;;  %v1955_v58 = vld [vmem:[#allocation5 + $0x328] ss:$16 sps:$4 sm:$0xff]  }
  0x6f   :  { %913 = vmatprep.subr.bf16.mxu0 %v1886_v59  ;;  %1035 = vmatprep.subr.bf16.mxu1 %v1888_v60  ;;  %v1960_v59 = vld [vmem:[#allocation5 + $0x344] ss:$16 sps:$4 sm:$0xff]   ;;  %v1963_v60 = vld [vmem:[#allocation5 + $0x34c] ss:$16 sps:$4 sm:$0xff]  }
  0x72   :  { %914 = vmatpush1.bf16.msra.mxu0 %v1890_v61  ;;  %1036 = vmatpush1.bf16.msra.mxu1 %v1891_v62  ;;  %v1958_v61 = vld [vmem:[#allocation5 + $0x340] ss:$16 sps:$4 sm:$0xff]   ;;  %v1961_v62 = vld [vmem:[#allocation5 + $0x348] ss:$16 sps:$4 sm:$0xff]  }
  0x73   :  { %915 = vmatprep.subr.bf16.mxu0 %v1892_v63  ;;  %1037 = vmatprep.subr.bf16.mxu1 %v1894_v0  ;;  %v1966_v63 = vld [vmem:[#allocation5 + $0x364] ss:$16 sps:$4 sm:$0xff]   ;;  %v1969_v0 = vld [vmem:[#allocation5 + $0x36c] ss:$16 sps:$4 sm:$0xff]  }
  0x76   :  { %916 = vmatpush1.bf16.msra.mxu0 %v1896_v1  ;;  %1038 = vmatpush1.bf16.msra.mxu1 %v1897_v2  ;;  %v1964_v1 = vld [vmem:[#allocation5 + $0x360] ss:$16 sps:$4 sm:$0xff]   ;;  %v1967_v2 = vld [vmem:[#allocation5 + $0x368] ss:$16 sps:$4 sm:$0xff]  }
  0x77   :  { %946 = vmatprep.subr.bf16.mxu0 %v1900_v3  ;;  %1068 = vmatprep.subr.bf16.mxu1 %v1903_v6  ;;  %v1972_v3 = vld [vmem:[#allocation5 + $0x384] ss:$16 sps:$4 sm:$0xff]   ;;  %v1973_v6 = vld [vmem:[#allocation5 + $0x388] ss:$16 sps:$4 sm:$0xff]  }
  0x79   :  { %918 = vmatmul.mubr.bf16.vlgmr.msra.gmra.mrb[0].mxu0 %v77_v9  ;;  %1040 = vmatmul.mubr.bf16.vlgmr.msra.gmra.mrb[0].mxu1 %v77_v9  ;;  %v1976_v9 = vld [vmem:[#allocation5 + $0x3a0] ss:$16 sps:$4 sm:$0xff]  }
  0x7a   :  { %947 = vmatpush1.bf16.msra.mxu0 %v1898_v7  ;;  %1069 = vmatpush1.bf16.msra.mxu1 %v1901_v8  ;;  %v1978_v7 = vld [vmem:[#allocation5 + $0x3a4] ss:$16 sps:$4 sm:$0xff]   ;;  %v1981_v8 = vld [vmem:[#allocation5 + $0x3ac] ss:$16 sps:$4 sm:$0xff]  }
  0x7b   :  { %948 = vmatprep.subr.bf16.mxu0 %v1906_v10  ;;  %1070 = vmatprep.subr.bf16.mxu1 %v1909_v11  ;;  %v1979_v10 = vld [vmem:[#allocation5 + $0x3a8] ss:$16 sps:$4 sm:$0xff]   ;;  %v1984_v11 = vld [vmem:[#allocation5 + $0x3c4] ss:$16 sps:$4 sm:$0xff]  }
  0x7c   :  { %927 = vmatprep.mubr.bf16.mxu0 %v82_v27  ;;  %1049 = vmatprep.mubr.bf16.mxu1 %v82_v27  ;;  %v76_v27 = vld [vmem:[#allocation2 + $0x98] sm:$0xff] }
  0x7e   :  { %949 = vmatpush1.bf16.msra.mxu0 %v1904_v12  ;;  %1071 = vmatpush1.bf16.msra.mxu1 %v1907_v13  ;;  %v1987_v12 = vld [vmem:[#allocation5 + $0x3cc] ss:$16 sps:$4 sm:$0xff]   ;;  %v1982_v13 = vld [vmem:[#allocation5 + $0x3c0] ss:$16 sps:$4 sm:$0xff]  }
  0x7f   :  { %950 = vmatprep.subr.bf16.mxu0 %v1912_v14  ;;  %1072 = vmatprep.subr.bf16.mxu1 %v1915_v15  ;;  %v1985_v14 = vld [vmem:[#allocation5 + $0x3c8] ss:$16 sps:$4 sm:$0xff]   ;;  %v1990_v15 = vld [vmem:[#allocation5 + $0x3e4] ss:$16 sps:$4 sm:$0xff]  }
  0x81   :  { %928 = vmatmul.mubr.bf16.gmra.mrb[4].mxu0 %v81_v29  ;;  %1050 = vmatmul.mubr.bf16.gmra.mrb[4].mxu1 %v81_v29  ;;  %v88_v29 = vpack.c.bf16 %v76_v27, %v76_v27 }
  0x82   :  { %951 = vmatpush1.bf16.msra.mxu0 %v1910_v16  ;;  %1073 = vmatpush1.bf16.msra.mxu1 %v1913_v17  ;;  %v1993_v16 = vld [vmem:[#allocation5 + $0x3ec] ss:$16 sps:$4 sm:$0xff]   ;;  %v1988_v17 = vld [vmem:[#allocation5 + $0x3e0] ss:$16 sps:$4 sm:$0xff]  }
  0x83   :  { %952 = vmatprep.subr.bf16.mxu0 %v1918_v18  ;;  %1074 = vmatprep.subr.bf16.mxu1 %v1921_v19  ;;  %v1991_v18 = vld [vmem:[#allocation5 + $0x3e8] ss:$16 sps:$4 sm:$0xff]   ;;  %v59_v19 = vld [vmem:[#allocation2 + $0x10] sm:$0xff] }
  0x84   :  { %937 = vmatprep.mubr.bf16.mxu0 %v86_v35  ;;  %1059 = vmatprep.mubr.bf16.mxu1 %v86_v35 }
  0x86   :  { %953 = vmatpush1.bf16.msra.mxu0 %v1916_v20  ;;  %1075 = vmatpush1.bf16.msra.mxu1 %v1919_v21  ;;  %v63_v20 = vld [vmem:[#allocation2 + $0x30] sm:$0xff]  ;;  %v68_v21 = vld [vmem:[#allocation2 + $0x58] sm:$0xff] }
  0x87   :  { %954 = vmatprep.subr.bf16.mxu0 %v1924_v22  ;;  %1076 = vmatprep.subr.bf16.mxu1 %v1927_v23  ;;  %v72_v22 = vld [vmem:[#allocation2 + $0x78] sm:$0xff]  ;;  %v79_v23 = vpack.c.bf16 %v63_v20, %v59_v19 }
  0x88   :  { %v84_v24 = vpack.c.bf16 %v72_v22, %v68_v21 }
  0x89   :  { %938 = vmatmul.mubr.bf16.gmra.mrb[8].mxu0 %v85_v41  ;;  %1060 = vmatmul.mubr.bf16.gmra.mrb[8].mxu1 %v85_v41  ;;  %v219_v41 = vld [vmem:[#allocation7 + $0x1] ss:$8 sm:$0xf] }
  0x8a   :  { %955 = vmatpush1.bf16.msra.mxu0 %v1922_v30  ;;  %1077 = vmatpush1.bf16.msra.mxu1 %v1925_v31  ;;  %v75_v30 = vld [vmem:[#allocation2 + $0x90] sm:$0xff] }
  0x8b   :  { %956 = vmatprep.subr.bf16.mxu0 %v1930_v32  ;;  %1078 = vmatprep.subr.bf16.mxu1 %v1933_v33  ;;  %v87_v31 = vpack.c.bf16 %v75_v30, %v75_v30  ;;  %v225_v32 = vlaneseq }
  0x8c   :  { %978 = vmatprep.mubr.bf16.mxu0 %v80_v48  ;;  %1100 = vmatprep.mubr.bf16.mxu1 %v80_v48 }
  0x8d   :  { %v226_v33 = vshrl.u32 %v225_v32, 7 }
  0x8e   :  { %957 = vmatpush1.bf16.msra.mxu0 %v1928_v37  ;;  %1079 = vmatpush1.bf16.msra.mxu1 %v1931_v38  ;;  %v217_v37 = vld [vmem:[#allocation7] ss:$8 sm:$0xf] }
  0x8f   :  { %958 = vmatprep.subr.bf16.mxu0 %v1936_v39  ;;  %1080 = vmatprep.subr.bf16.mxu1 %v1939_v40  ;;  %v227_v35 = vsub.s32 0, %v226_v33  ;;  %v235_v36 = vsub.s32 2, %v226_v33  ;;  %v231_v38 = vsub.s32 1, %v226_v33  ;;  %v239_v39 = vsub.s32 3, %v226_v33 }
  0x90   :  { %v1231_v40 = vsub.f32 0.0, %v221_v34 }
  0x91   :  { %v2230_v44 = vrot.slane %v217_v37, %v235_v36  ;;  %v2238_v48 = vrot.slane %v219_v41, %v227_v35 }
  0x92   :  { %959 = vmatpush1.bf16.msra.mxu0 %v1934_v42  ;;  %1081 = vmatpush1.bf16.msra.mxu1 %v1937_v43  ;;  %v223_v42 = vld [vmem:[#allocation7 + $0x3] ss:$8 sm:$0xf]  ;;  %v2228_v43 = vrot.slane %v217_v37, %v227_v35 }
  0x93   :  { %960 = vmatprep.subr.bf16.mxu0 %v1942_v45  ;;  %1082 = vmatprep.subr.bf16.mxu1 %v1945_v46  ;;  %v2232_v45 = vrot.slane %v217_v37, %v231_v38  ;;  %v2234_v46 = vrot.slane %v217_v37, %v239_v39  ;;  %v2236_v47 = vrot.slane %v223_v42, %v227_v35 }
  0x96   :  { %961 = vmatpush1.bf16.msra.mxu0 %v1940_v49  ;;  %1083 = vmatpush1.bf16.msra.mxu1 %v1943_v50  ;;  %v2240_v49 = vrot.slane %v1231_v40, %v227_v35  ;;  %v2242_v50 = vrot.slane %v223_v42, %v235_v36 }
  0x97   :  { %962 = vmatprep.subr.bf16.mxu0 %v1948_v51  ;;  %1084 = vmatprep.subr.bf16.mxu1 %v1951_v52 }
  0x9a   :  { %963 = vmatpush1.bf16.msra.mxu0 %v1946_v53  ;;  %1085 = vmatpush1.bf16.msra.mxu1 %v1949_v54  ;;  %v2244_v53 = vrot.slane %v219_v41, %v235_v36  ;;  %v2246_v54 = vrot.slane %v1231_v40, %v235_v36 }
  0x9b   :  { %964 = vmatprep.subr.bf16.mxu0 %v1954_v55  ;;  %1086 = vmatprep.subr.bf16.mxu1 %v1957_v56  ;;  %v2248_v55 = vrot.slane %v223_v42, %v231_v38  ;;  %v2250_v56 = vrot.slane %v223_v42, %v239_v39 }
  0x9e   :  { %965 = vmatpush1.bf16.msra.mxu0 %v1952_v57  ;;  %1087 = vmatpush1.bf16.msra.mxu1 %v1955_v58 }
  0x9f   :  { %966 = vmatprep.subr.bf16.mxu0 %v1960_v59  ;;  %1088 = vmatprep.subr.bf16.mxu1 %v1963_v60  ;;  %v2254_v60 = vrot.slane %v219_v41, %v231_v38 }
  0xa2   :  { %967 = vmatpush1.bf16.msra.mxu0 %v1958_v61  ;;  %1089 = vmatpush1.bf16.msra.mxu1 %v1961_v62  ;;  %v2256_v61 = vrot.slane %v1231_v40, %v231_v38 }
  0xa3   :  { %968 = vmatprep.subr.bf16.mxu0 %v1966_v63  ;;  %1090 = vmatprep.subr.bf16.mxu1 %v1969_v0 }
  0xa6   :  { %969 = vmatpush1.bf16.msra.mxu0 %v1964_v1  ;;  %1091 = vmatpush1.bf16.msra.mxu1 %v1967_v2  ;;  %v2260_v1 = vrot.slane %v219_v41, %v239_v39  ;;  %v2262_v2 = vrot.slane %v1231_v40, %v239_v39 }
  0xa7   :  { %970 = vmatprep.subr.bf16.mxu0 %v1972_v3  ;;  %1092 = vmatprep.subr.bf16.mxu1 %v1975_v4 }
  0xaa   :  { %971 = vmatpush1.bf16.msra.mxu0 %v1970_v5  ;;  %1093 = vmatpush1.bf16.msra.mxu1 %v1973_v6 }
  0xab   :  { %972 = vmatprep.subr.bf16.mxu0 %v1978_v7  ;;  %1094 = vmatprep.subr.bf16.mxu1 %v1981_v8 }
  0xae   :  { %973 = vmatpush1.bf16.msra.mxu0 %v1976_v9  ;;  %1095 = vmatpush1.bf16.msra.mxu1 %v1979_v10 }
  0xaf   :  { %974 = vmatprep.subr.bf16.mxu0 %v1984_v11  ;;  %1096 = vmatprep.subr.bf16.mxu1 %v1987_v12 }
  0xb2   :  { %975 = vmatpush1.bf16.msra.mxu0 %v1982_v13  ;;  %1097 = vmatpush1.bf16.msra.mxu1 %v1985_v14 }
  0xb3   :  { %976 = vmatprep.subr.bf16.mxu0 %v1990_v15  ;;  %1098 = vmatprep.subr.bf16.mxu1 %v1993_v16 }
  0xb6   :  { %977 = vmatpush1.bf16.msra.mxu0 %v1988_v17  ;;  %1099 = vmatpush1.bf16.msra.mxu1 %v1991_v18 }
  0xb9   :  { %979 = vmatmul.mubr.bf16.vlgmr.msra.gmra.mrb[0].mxu0 %v79_v23  ;;  %1101 = vmatmul.mubr.bf16.vlgmr.msra.gmra.mrb[0].mxu1 %v79_v23 }
  0xba   :  { %988 = vmatprep.mubr.bf16.mxu0 %v84_v24  ;;  %1110 = vmatprep.mubr.bf16.mxu1 %v84_v24 }
  0xc1   :  { %989 = vmatmul.mubr.bf16.gmra.mrb[4].mxu0 %v83_v28  ;;  %1111 = vmatmul.mubr.bf16.gmra.mrb[4].mxu1 %v83_v28 }
  0xc2   :  { %998 = vmatprep.mubr.bf16.mxu0 %v88_v29  ;;  %1120 = vmatprep.mubr.bf16.mxu1 %v88_v29 }
  0xc9   :  { %999 = vmatmul.mubr.bf16.gmra.mrb[8].mxu0 %v87_v31  ;;  %1121 = vmatmul.mubr.bf16.gmra.mrb[8].mxu1 %v87_v31 }
 0x18c   :  { %v980_v51 = vpop.f32.mrb[0].mxu0  ;;  %v1102_v52 = vpop.f32.mrb[0].mxu1 }
 0x18d   :  { %v1749_v57 = vadd.f32 %v980_v51, %v2228_v43  ;;  %v1759_v58 = vadd.f32 %v1102_v52, %v2230_v44  ;;  %v982_v59 = vpop.f32.mrb[1].mxu0  ;;  %v1104_v62 = vpop.f32.mrb[1].mxu1 }
 0x18e   :  { %v1750_v63 = vadd.f32 %v982_v59, %v2232_v45  ;;  %v1760_v0 = vadd.f32 %v1104_v62, %v2234_v46  ;;  %v984_v3 = vpop.f32.mrb[2].mxu0  ;;  %v1106_v4 = vpop.f32.mrb[2].mxu1 }
 0x18f   :  { %v2265_v5 = vsub.f32 %v1749_v57, %v2236_v47  ;;  %v2268_v6 = vsub.f32 %v1759_v58, %v2242_v50  ;;  %v1751_v7 = vadd.f32 %v984_v3, %v2228_v43  ;;  %v1761_v8 = vadd.f32 %v1106_v4, %v2230_v44  ;;  %v986_v9 = vpop.f32.mrb[3].mxu0  ;;  %v1108_v10 = vpop.f32.mrb[3].mxu1 }
 0x190   :  { %v2273_v11 = vsub.f32 %v1750_v63, %v2248_v55  ;;  %v2276_v12 = vsub.f32 %v1760_v0, %v2250_v56  ;;  %v1752_v13 = vadd.f32 %v986_v9, %v2232_v45  ;;  %v1762_v14 = vadd.f32 %v1108_v10, %v2234_v46 }
 0x191   :  { %vm1170_vm0 = vcmp.gt.f32.partialorder %v2265_v5, 0.0  ;;  %v1211_v15 = vmul.f32 %v2238_v48, %v2265_v5  ;;  %v1253_v16 = vmul.f32 %v2240_v49, %v2265_v5  ;;  %vm1172_vm1 = vcmp.gt.f32.partialorder %v2268_v6, 0.0 }
 0x192   :  { %v1213_v17 = vmul.f32 %v2244_v53, %v2268_v6  ;;  %v1255_v18 = vmul.f32 %v2246_v54, %v2268_v6  ;;  %vm1171_vm2 = vcmp.gt.f32.partialorder %v2273_v11, 0.0  ;;  %v1212_v19 = vmul.f32 %v2254_v60, %v2273_v11 }
 0x193   :  { %v1273_v20 = vsel %vm1170_vm0, %v1211_v15, %v1253_v16  ;;  %v1254_v21 = vmul.f32 %v2256_v61, %v2273_v11  ;;  %vm1173_vm3 = vcmp.gt.f32.partialorder %v2276_v12, 0.0  ;;  %v1214_v22 = vmul.f32 %v2260_v1, %v2276_v12 }
 0x194   :  { %v1293_v23 = vmul.f32 1.442695, %v1273_v20  ;;  %v1275_v24 = vsel %vm1172_vm1, %v1213_v17, %v1255_v18  ;;  %v1256_v25 = vmul.f32 %v2262_v2, %v2276_v12  ;;  %v2305_v26 = vsub.f32 %v1751_v7, %v2236_v47  ;;  %v990_v27 = vpop.f32.mrb[4].mxu0  ;;  %v1112_v28 = vpop.f32.mrb[4].mxu1 }
 0x195   :  { %v1297_v29 = vmul.f32 1.442695, %v1275_v24  ;;  %v1274_v30 = vsel %vm1171_vm2, %v1212_v19, %v1254_v21  ;;  %v2310_v31 = vsub.f32 %v1761_v8, %v2242_v50  ;;  %v2313_v32 = vsub.f32 %v1752_v13, %v2248_v55  ;;  %v992_v33 = vpop.f32.mrb[5].mxu0  ;;  %v1114_v34 = vpop.f32.mrb[5].mxu1 }
 0x196   :  { %1994 = vpow2.f32 %v1293_v23  ;;  %v1295_v35 = vmul.f32 1.442695, %v1274_v30  ;;  %v1276_v36 = vsel %vm1173_vm3, %v1214_v22, %v1256_v25  ;;  %vm1174_vm4 = vcmp.gt.f32.partialorder %v2305_v26, 0.0  ;;  %v994_v37 = vpop.f32.mrb[6].mxu0  ;;  %v2318_v38 = vpop.f32.mrb[6].mxu1 }
 0x197   :  { %1996 = vpow2.f32 %v1297_v29  ;;  %v1299_v39 = vmul.f32 1.442695, %v1276_v36  ;;  %v1215_v40 = vmul.f32 %v2238_v48, %v2305_v26  ;;  %v1257_v41 = vmul.f32 %v2240_v49, %v2305_v26  ;;  %v2324_v42 = vpop.f32.mrb[7].mxu0  ;;  %v2326_v51 = vpop.f32.mrb[7].mxu1 }
 0x198   :  { %1998 = vpow2.f32 %v1295_v35  ;;  %vm1176_vm5 = vcmp.gt.f32.partialorder %v2310_v31, 0.0  ;;  %v1217_v52 = vmul.f32 %v2244_v53, %v2310_v31  ;;  %v1259_v57 = vmul.f32 %v2246_v54, %v2310_v31 }
 0x199   :  { %2000 = vpow2.f32 %v1299_v39  ;;  %v1277_v58 = vsel %vm1174_vm4, %v1215_v40, %v1257_v41  ;;  %vm1175_vm6 = vcmp.gt.f32.partialorder %v2313_v32, 0.0  ;;  %v1216_v59 = vmul.f32 %v2254_v60, %v2313_v32 }
 0x19a   :  { %v1301_v62 = vmul.f32 1.442695, %v1277_v58  ;;  %v1279_v63 = vsel %vm1176_vm5, %v1217_v52, %v1259_v57  ;;  %v1258_v0 = vmul.f32 %v2256_v61, %v2313_v32  ;;  %v2343_v3 = vsub.f32 %v1762_v14, %v2250_v56 }
 0x19b   :  { %v1305_v4 = vmul.f32 1.442695, %v1279_v63  ;;  %v1753_v7 = vadd.f32 %v990_v27, %v2228_v43  ;;  %v1763_v8 = vadd.f32 %v1112_v28, %v2230_v44  ;;  %v1754_v9 = vadd.f32 %v992_v33, %v2232_v45 }
 0x19c   :  { %2002 = vpow2.f32 %v1301_v62  ;;  %v1278_v10 = vsel %vm1175_vm6, %v1216_v59, %v1258_v0  ;;  %vm1177_vm7 = vcmp.gt.f32.partialorder %v2343_v3, 0.0  ;;  %v1218_v13 = vmul.f32 %v2260_v1, %v2343_v3  ;;  %v2353_v15 = vpop.f32.mrb[8].mxu0  ;;  %v2355_v14 = vpop.f32.mrb[8].mxu1 }
 0x19d   :  { %2004 = vpow2.f32 %v1305_v4  ;;  %v1303_v16 = vmul.f32 1.442695, %v1278_v10  ;;  %v1260_v17 = vmul.f32 %v2262_v2, %v2343_v3  ;;  %v2360_v18 = vsub.f32 %v1753_v7, %v2236_v47  ;;  %v2362_v19 = vpop.f32.mrb[9].mxu0  ;;  %v2364_v20 = vpop.f32.mrb[9].mxu1 }
 0x19e   :  { %v2367_v21 = vsub.f32 %v1763_v8, %v2242_v50  ;;  %v2370_v22 = vsub.f32 %v1754_v9, %v2248_v55  ;;  %v2373_v23 = vadd.f32 %v1114_v34, %v2234_v46  ;;  %v1004_v24 = vpop.f32.mrb[10].mxu0  ;;  %v1126_v25 = vpop.f32.mrb[10].mxu1  ;;  %v2384_v34 = vadd.f32 %v994_v37, %v2228_v43 }
 0x19f   :  { %2006 = vpow2.f32 %v1303_v16  ;;  %v1280_v27 = vsel %vm1177_vm7, %v1218_v13, %v1260_v17  ;;  %vm1178_vm8 = vcmp.gt.f32.partialorder %v2360_v18, 0.0  ;;  %v1219_v28 = vmul.f32 %v2238_v48, %v2360_v18  ;;  %v1005_v29 = vpop.f32.mrb[11].mxu0  ;;  %v1127_v30 = vpop.f32.mrb[11].mxu1 }
 0x1a0   :  { %v1995_v33 = vpop.eup %1994  ;;  %v1307_v35 = vmul.f32 1.442695, %v1280_v27  ;;  %v1261_v36 = vmul.f32 %v2240_v49, %v2360_v18  ;;  %vm1180_vm9 = vcmp.gt.f32.partialorder %v2367_v21, 0.0  ;;  %v1221_v52 = vmul.f32 %v2244_v53, %v2367_v21 }
 0x1a1   :  { %v1997_v39 = vpop.eup %1996  ;;  %v1709_v40 = vadd.f32 -1.0, %v1995_v33  ;;  %v1353_v41 = vsub.f32 1.0, %v1995_v33  ;;  %v1263_v57 = vmul.f32 %v2246_v54, %v2367_v21  ;;  %vm1179_vm11 = vcmp.gt.f32.partialorder %v2370_v22, 0.0 }
 0x1a2   :  { %v1999_v58 = vpop.eup %1998  ;;  %v1711_v59 = vadd.f32 -1.0, %v1997_v39  ;;  %v1355_v62 = vsub.f32 1.0, %v1997_v39  ;;  %2008 = vpow2.f32 %v1307_v35  ;;  %v1281_v63 = vsel %vm1178_vm8, %v1219_v28, %v1261_v36 }
 0x1a3   :  { %v2001_v0 = vpop.eup %2000  ;;  %v1373_v37 = vsel %vm1170_vm0, %v1709_v40, %v1353_v41  ;;  %v1710_v4 = vadd.f32 -1.0, %v1999_v58  ;;  %v1354_v7 = vsub.f32 1.0, %v1999_v58  ;;  %v1309_v8 = vmul.f32 1.442695, %v1281_v63 }
 0x1a4   :  { %vm1467_vm10 = vcmp.ge.f32.partialorder %v1373_v37, 0.0  ;;  %v1487_v9 = vmul.f32 0.2, %v1373_v37  ;;  %v1375_v10 = vsel %vm1172_vm1, %v1711_v59, %v1355_v62  ;;  %v1712_v13 = vadd.f32 -1.0, %v2001_v0 }
 0x1a5   :  { %vm1469_vm12 = vcmp.ge.f32.partialorder %v1375_v10, 0.0  ;;  %v1489_v16 = vmul.f32 0.2, %v1375_v10  ;;  %v1374_v17 = vsel %vm1171_vm2, %v1710_v4, %v1354_v7  ;;  %v1356_v24 = vsub.f32 1.0, %v2001_v0 }
 0x1a6   :  { %v2003_v25 = vpop.eup %2002  ;;  %v1507_v5 = vsel %vm1467_vm10, %v1373_v37, %v1487_v9  ;;  %v1739_v27 = vpack.c.bf16 %v1374_v17, %v1373_v37  ;;  %vm1468_vm13 = vcmp.ge.f32.partialorder %v1374_v17, 0.0  ;;  %v1488_v28 = vmul.f32 0.2, %v1374_v17 }
 0x1a7   :  { %v2005_v29 = vpop.eup %2004  ;;  %1527 = vst [vmem:[#allocation9] sm:$0xff] %v1507_v5  ;;  %v1509_v30 = vsel %vm1469_vm12, %v1375_v10, %v1489_v16  ;;  %v1376_v6 = vsel %vm1173_vm3, %v1712_v13, %v1356_v24  ;;  %v1713_v33 = vadd.f32 -1.0, %v2003_v25  ;;  %v1357_v35 = vsub.f32 1.0, %v2003_v25 }
 0x1a8   :  { %1529 = vst [vmem:[#allocation9 + $0x10] sm:$0xff] %v1509_v30  ;;  %1457 = vst [vmem:[#allocation8] sm:$0xff] %v1739_v27  ;;  %v1508_v36 = vsel %vm1468_vm13, %v1374_v17, %v1488_v28  ;;  %v1740_v39 = vpack.c.bf16 %v1376_v6, %v1375_v10  ;;  %vm1470_vm14 = vcmp.ge.f32.partialorder %v1376_v6, 0.0  ;;  %v1490_v11 = vmul.f32 0.2, %v1376_v6 }
 0x1a9   :  { %v2007_v40 = vpop.eup %2006  ;;  %1528 = vst [vmem:[#allocation9 + $0x8] sm:$0xff] %v1508_v36  ;;  %v1377_v41 = vsel %vm1174_vm4, %v1713_v33, %v1357_v35  ;;  %v1715_v58 = vadd.f32 -1.0, %v2005_v29  ;;  %v1359_v59 = vsub.f32 1.0, %v2005_v29  ;;  %2010 = vpow2.f32 %v1309_v8 }
 0x1aa   :  { %1458 = vst [vmem:[#allocation8 + $0x8] sm:$0xff] %v1740_v39  ;;  %v1510_v62 = vsel %vm1470_vm14, %v1376_v6, %v1490_v11  ;;  %vm1471_vm15 = vcmp.ge.f32.partialorder %v1377_v41, 0.0  ;;  %v1491_v12 = vmul.f32 0.2, %v1377_v41  ;;  %v1714_v63 = vadd.f32 -1.0, %v2007_v40 }
 0x1ab   :  { %1530 = vst [vmem:[#allocation9 + $0x18] sm:$0xff] %v1510_v62  ;;  %v1379_v0 = vsel %vm1176_vm5, %v1715_v58, %v1359_v59  ;;  %v1358_v37 = vsub.f32 1.0, %v2007_v40  ;;  %v1283_v4 = vsel %vm1180_vm9, %v1221_v52, %v1263_v57  ;;  %v1220_v26 = vmul.f32 %v2254_v60, %v2370_v22 }
 0x1ac   :  { %v2009_v7 = vpop.eup %2008  ;;  %v1511_v9 = vsel %vm1471_vm15, %v1377_v41, %v1491_v12  ;;  %vm1473_vm0 = vcmp.ge.f32.partialorder %v1379_v0, 0.0  ;;  %v1493_v8 = vmul.f32 0.2, %v1379_v0  ;;  %v1313_v10 = vmul.f32 1.442695, %v1283_v4 }
 0x1ad   :  { %1531 = vst [vmem:[#allocation9 + $0x20] sm:$0xff] %v1511_v9  ;;  %v1378_v13 = vsel %vm1175_vm6, %v1714_v63, %v1358_v37  ;;  %v1716_v16 = vadd.f32 -1.0, %v2009_v7  ;;  %v1360_v17 = vsub.f32 1.0, %v2009_v7  ;;  %v1262_v31 = vmul.f32 %v2256_v61, %v2370_v22 }
 0x1ae   :  { %v1513_v24 = vsel %vm1473_vm0, %v1379_v0, %v1493_v8  ;;  %v1741_v25 = vpack.c.bf16 %v1378_v13, %v1377_v41  ;;  %vm1472_vm1 = vcmp.ge.f32.partialorder %v1378_v13, 0.0  ;;  %v1492_v52 = vmul.f32 0.2, %v1378_v13 }
 0x1af   :  { %1533 = vst [vmem:[#allocation9 + $0x30] sm:$0xff] %v1513_v24  ;;  %v1380_v57 = vsel %vm1177_vm7, %v1716_v16, %v1360_v17  ;;  %2012 = vpow2.f32 %v1313_v10  ;;  %v1282_v5 = vsel %vm1179_vm11, %v1220_v26, %v1262_v31  ;;  %v2419_v32 = vsub.f32 %v2373_v23, %v2250_v56 }
 0x1b0   :  { %1459 = vst [vmem:[#allocation8 + $0x10] sm:$0xff] %v1741_v25  ;;  %v1512_v27 = vsel %vm1472_vm1, %v1378_v13, %v1492_v52  ;;  %v1742_v28 = vpack.c.bf16 %v1380_v57, %v1379_v0  ;;  %vm1474_vm2 = vcmp.ge.f32.partialorder %v1380_v57, 0.0  ;;  %v1494_v29 = vmul.f32 0.2, %v1380_v57 }
 0x1b1   :  { %1532 = vst [vmem:[#allocation9 + $0x28] sm:$0xff] %v1512_v27  ;;  %v1311_v30 = vmul.f32 1.442695, %v1282_v5  ;;  %vm1181_vm3 = vcmp.gt.f32.partialorder %v2419_v32, 0.0  ;;  %v1222_v3 = vmul.f32 %v2260_v1, %v2419_v32  ;;  %v1264_v6 = vmul.f32 %v2262_v2, %v2419_v32 }
 0x1b2   :  { %1460 = vst [vmem:[#allocation8 + $0x18] sm:$0xff] %v1742_v28  ;;  %v1514_v33 = vsel %vm1474_vm2, %v1380_v57, %v1494_v29  ;;  %v2428_v23 = vsub.f32 %v2384_v34, %v2236_v47  ;;  %v1765_v35 = vadd.f32 %v2318_v38, %v2230_v44  ;;  %v1756_v36 = vadd.f32 %v2324_v42, %v2232_v45 }
 0x1b3   :  { %v2011_v39 = vpop.eup %2010  ;;  %1534 = vst [vmem:[#allocation9 + $0x38] sm:$0xff] %v1514_v33  ;;  %2014 = vpow2.f32 %v1311_v30  ;;  %v1284_v11 = vsel %vm1181_vm3, %v1222_v3, %v1264_v6  ;;  %v1766_v40 = vadd.f32 %v2326_v51, %v2234_v46  ;;  %v1757_v41 = vadd.f32 %v2353_v15, %v2228_v43 }
 0x1b4   :  { %v1717_v34 = vadd.f32 -1.0, %v2011_v39  ;;  %v1361_v58 = vsub.f32 1.0, %v2011_v39  ;;  %v1315_v59 = vmul.f32 1.442695, %v1284_v11  ;;  %vm1182_vm4 = vcmp.gt.f32.partialorder %v2428_v23, 0.0 }
 0x1b5   :  { %v1223_v38 = vmul.f32 %v2238_v48, %v2428_v23  ;;  %v1265_v42 = vmul.f32 %v2240_v49, %v2428_v23  ;;  %v2446_v62 = vsub.f32 %v1765_v35, %v2242_v50  ;;  %v2449_v12 = vsub.f32 %v1756_v36, %v2248_v55 }
 0x1b6   :  { %v1381_v43 = vsel %vm1178_vm8, %v1717_v34, %v1361_v58  ;;  %2016 = vpow2.f32 %v1315_v59  ;;  %v2454_v51 = vsub.f32 %v1766_v40, %v2250_v56  ;;  %v2457_v15 = vsub.f32 %v1757_v41, %v2236_v47 }
 0x1b7   :  { %vm1475_vm5 = vcmp.ge.f32.partialorder %v1381_v43, 0.0  ;;  %v1495_v63 = vmul.f32 0.2, %v1381_v43  ;;  %v1285_v0 = vsel %vm1182_vm4, %v1223_v38, %v1265_v42  ;;  %vm1184_vm6 = vcmp.gt.f32.partialorder %v2446_v62, 0.0 }
 0x1b8   :  { %v1317_v37 = vmul.f32 1.442695, %v1285_v0  ;;  %v1225_v4 = vmul.f32 %v2244_v53, %v2446_v62  ;;  %v1267_v18 = vmul.f32 %v2246_v54, %v2446_v62  ;;  %vm1183_vm7 = vcmp.gt.f32.partialorder %v2449_v12, 0.0 }
 0x1b9   :  { %v2013_v26 = vpop.eup %2012  ;;  %v1515_v7 = vsel %vm1475_vm5, %v1381_v43, %v1495_v63  ;;  %v1224_v47 = vmul.f32 %v2254_v60, %v2449_v12  ;;  %v1266_v9 = vmul.f32 %v2256_v61, %v2449_v12  ;;  %vm1185_vm8 = vcmp.gt.f32.partialorder %v2454_v51, 0.0 }
 0x1ba   :  { %1535 = vst [vmem:[#allocation9 + $0x40] sm:$0xff] %v1515_v7  ;;  %v1719_v8 = vadd.f32 -1.0, %v2013_v26  ;;  %v1363_v10 = vsub.f32 1.0, %v2013_v26  ;;  %2018 = vpow2.f32 %v1317_v37  ;;  %v1287_v13 = vsel %vm1184_vm6, %v1225_v4, %v1267_v18 }
 0x1bb   :  { %v1321_v16 = vmul.f32 1.442695, %v1287_v13  ;;  %v1286_v17 = vsel %vm1183_vm7, %v1224_v47, %v1266_v9  ;;  %v1226_v31 = vmul.f32 %v2260_v1, %v2454_v51  ;;  %v1268_v24 = vmul.f32 %v2262_v2, %v2454_v51 }
 0x1bc   :  { %v1383_v25 = vsel %vm1180_vm9, %v1719_v8, %v1363_v10  ;;  %v1319_v52 = vmul.f32 1.442695, %v1286_v17  ;;  %vm1186_vm10 = vcmp.gt.f32.partialorder %v2457_v15, 0.0  ;;  %v1227_v57 = vmul.f32 %v2238_v48, %v2457_v15 }
 0x1bd   :  { %v2015_v5 = vpop.eup %2014  ;;  %vm1477_vm12 = vcmp.ge.f32.partialorder %v1383_v25, 0.0  ;;  %v1497_v27 = vmul.f32 0.2, %v1383_v25  ;;  %2020 = vpow2.f32 %v1321_v16  ;;  %v1288_v28 = vsel %vm1185_vm8, %v1226_v31, %v1268_v24 }
 0x1be   :  { %v1718_v29 = vadd.f32 -1.0, %v2015_v5  ;;  %v1362_v30 = vsub.f32 1.0, %v2015_v5  ;;  %2022 = vpow2.f32 %v1319_v52  ;;  %v1323_v3 = vmul.f32 1.442695, %v1288_v28 }
 0x1bf   :  { %v1517_v6 = vsel %vm1477_vm12, %v1383_v25, %v1497_v27  ;;  %v1269_v21 = vmul.f32 %v2240_v49, %v2457_v15  ;;  %v1767_v33 = vadd.f32 %v2355_v14, %v2230_v44  ;;  %v1758_v48 = vadd.f32 %v2362_v19, %v2232_v45 }
 0x1c0   :  { %v2017_v35 = vpop.eup %2016  ;;  %1537 = vst [vmem:[#allocation9 + $0x50] sm:$0xff] %v1517_v6  ;;  %v1382_v36 = vsel %vm1179_vm11, %v1718_v29, %v1362_v30  ;;  %2024 = vpow2.f32 %v1323_v3  ;;  %v1768_v39 = vadd.f32 %v2364_v20, %v2234_v46 }
 0x1c1   :  { %v1743_v11 = vpack.c.bf16 %v1382_v36, %v1381_v43  ;;  %vm1476_vm9 = vcmp.ge.f32.partialorder %v1382_v36, 0.0  ;;  %v1496_v40 = vmul.f32 0.2, %v1382_v36  ;;  %v1720_v41 = vadd.f32 -1.0, %v2017_v35 }
 0x1c2   :  { %v1364_v49 = vsub.f32 1.0, %v2017_v35  ;;  %v1289_v44 = vsel %vm1186_vm10, %v1227_v57, %v1269_v21  ;;  %v2500_v14 = vsub.f32 %v1767_v33, %v2242_v50  ;;  %v2503_v45 = vsub.f32 %v1758_v48, %v2248_v55 }
 0x1c3   :  { %1461 = vst [vmem:[#allocation8 + $0x20] sm:$0xff] %v1743_v11  ;;  %v1516_v19 = vsel %vm1476_vm9, %v1382_v36, %v1496_v40  ;;  %v1325_v22 = vmul.f32 1.442695, %v1289_v44  ;;  %v2506_v34 = vsub.f32 %v1768_v39, %v2250_v56 }
 0x1c4   :  { %v2019_v46 = vpop.eup %2018  ;;  %1536 = vst [vmem:[#allocation9 + $0x48] sm:$0xff] %v1516_v19  ;;  %v1384_v20 = vsel %vm1181_vm3, %v1720_v41, %v1364_v49  ;;  %vm1188_vm11 = vcmp.gt.f32.partialorder %v2500_v14, 0.0  ;;  %v1229_v50 = vmul.f32 %v2244_v53, %v2500_v14  ;;  %v1271_v55 = vmul.f32 %v2246_v54, %v2500_v14 }
 0x1c5   :  { %v1744_v58 = vpack.c.bf16 %v1384_v20, %v1383_v25  ;;  %vm1478_vm13 = vcmp.ge.f32.partialorder %v1384_v20, 0.0  ;;  %v1498_v59 = vmul.f32 0.2, %v1384_v20  ;;  %v1721_v38 = vadd.f32 -1.0, %v2019_v46 }
 0x1c6   :  { %v1365_v42 = vsub.f32 1.0, %v2019_v46  ;;  %2026 = vpow2.f32 %v1325_v22  ;;  %v1291_v56 = vsel %vm1188_vm11, %v1229_v50, %v1271_v55  ;;  %vm1187_vm14 = vcmp.gt.f32.partialorder %v2503_v45, 0.0 }
 0x1c7   :  { %v2021_v32 = vpop.eup %2020  ;;  %1462 = vst [vmem:[#allocation8 + $0x28] sm:$0xff] %v1744_v58  ;;  %v1518_v43 = vsel %vm1478_vm13, %v1384_v20, %v1498_v59  ;;  %v1329_v63 = vmul.f32 1.442695, %v1291_v56  ;;  %v1228_v53 = vmul.f32 %v2254_v60, %v2503_v45  ;;  %v1270_v54 = vmul.f32 %v2256_v61, %v2503_v45 }
 0x1c8   :  { %v2023_v0 = vpop.eup %2022  ;;  %1538 = vst [vmem:[#allocation9 + $0x58] sm:$0xff] %v1518_v43  ;;  %v1385_v37 = vsel %vm1182_vm4, %v1721_v38, %v1365_v42  ;;  %v1723_v4 = vadd.f32 -1.0, %v2021_v32  ;;  %v1367_v18 = vsub.f32 1.0, %v2021_v32  ;;  %vm1189_vm15 = vcmp.gt.f32.partialorder %v2506_v34, 0.0 }
 0x1c9   :  { %vm1479_vm0 = vcmp.ge.f32.partialorder %v1385_v37, 0.0  ;;  %v1499_v26 = vmul.f32 0.2, %v1385_v37  ;;  %v1722_v7 = vadd.f32 -1.0, %v2023_v0  ;;  %v1366_v47 = vsub.f32 1.0, %v2023_v0 }
 0x1ca   :  { %v2025_v9 = vpop.eup %2024  ;;  %v1387_v60 = vsel %vm1184_vm6, %v1723_v4, %v1367_v18  ;;  %2028 = vpow2.f32 %v1329_v63  ;;  %v1290_v61 = vsel %vm1187_vm14, %v1228_v53, %v1270_v54  ;;  %v1230_v23 = vmul.f32 %v2260_v1, %v2506_v34 }
 0x1cb   :  { %v1519_v8 = vsel %vm1479_vm0, %v1385_v37, %v1499_v26  ;;  %vm1481_vm1 = vcmp.ge.f32.partialorder %v1387_v60, 0.0  ;;  %v1501_v10 = vmul.f32 0.2, %v1387_v60  ;;  %v1386_v13 = vsel %vm1183_vm7, %v1722_v7, %v1366_v47 }
 0x1cc   :  { %1539 = vst [vmem:[#allocation9 + $0x60] sm:$0xff] %v1519_v8  ;;  %v1745_v16 = vpack.c.bf16 %v1386_v13, %v1385_v37  ;;  %vm1480_vm2 = vcmp.ge.f32.partialorder %v1386_v13, 0.0  ;;  %v1500_v17 = vmul.f32 0.2, %v1386_v13  ;;  %v1724_v31 = vadd.f32 -1.0, %v2025_v9 }
 0x1cd   :  { %v1521_v62 = vsel %vm1481_vm1, %v1387_v60, %v1501_v10  ;;  %v1368_v24 = vsub.f32 1.0, %v2025_v9  ;;  %v1327_v25 = vmul.f32 1.442695, %v1290_v61  ;;  %v1272_v52 = vmul.f32 %v2262_v2, %v2506_v34 }
 0x1ce   :  { %1541 = vst [vmem:[#allocation9 + $0x70] sm:$0xff] %v1521_v62  ;;  %1463 = vst [vmem:[#allocation8 + $0x30] sm:$0xff] %v1745_v16  ;;  %v1520_v1 = vsel %vm1480_vm2, %v1386_v13, %v1500_v17 }
 0x1cf   :  { %1540 = vst [vmem:[#allocation9 + $0x68] sm:$0xff] %v1520_v1  ;;  %v1388_v57 = vsel %vm1185_vm8, %v1724_v31, %v1368_v24  ;;  %2030 = vpow2.f32 %v1327_v25  ;;  %v1292_v12 = vsel %vm1189_vm15, %v1230_v23, %v1272_v52 }
 0x1d0   :  { %v2027_v5 = vpop.eup %2026  ;;  %v1746_v27 = vpack.c.bf16 %v1388_v57, %v1387_v60  ;;  %vm1482_vm3 = vcmp.ge.f32.partialorder %v1388_v57, 0.0  ;;  %v1502_v28 = vmul.f32 0.2, %v1388_v57  ;;  %v1331_v29 = vmul.f32 1.442695, %v1292_v12 }
 0x1d1   :  { %v1725_v30 = vadd.f32 -1.0, %v2027_v5  ;;  %v1369_v3 = vsub.f32 1.0, %v2027_v5 }
 0x1d2   :  { %1464 = vst [vmem:[#allocation8 + $0x38] sm:$0xff] %v1746_v27  ;;  %v1522_v2 = vsel %vm1482_vm3, %v1388_v57, %v1502_v28  ;;  %2032 = vpow2.f32 %v1331_v29 }
 0x1d3   :  { %1542 = vst [vmem:[#allocation9 + $0x78] sm:$0xff] %v1522_v2  ;;  %v1389_v6 = vsel %vm1186_vm10, %v1725_v30, %v1369_v3 }
 0x1d4   :  { %v2029_v51 = vpop.eup %2028  ;;  %vm1483_vm4 = vcmp.ge.f32.partialorder %v1389_v6, 0.0  ;;  %v1503_v21 = vmul.f32 0.2, %v1389_v6 }
 0x1d5   :  { %v1727_v33 = vadd.f32 -1.0, %v2029_v51  ;;  %v1371_v48 = vsub.f32 1.0, %v2029_v51 }
 0x1d6   :  { %v1523_v35 = vsel %vm1483_vm4, %v1389_v6, %v1503_v21 }
 0x1d7   :  { %1543 = vst [vmem:[#allocation9 + $0x80] sm:$0xff] %v1523_v35  ;;  %v1391_v36 = vsel %vm1188_vm11, %v1727_v33, %v1371_v48 }
 0x1d8   :  { %vm1485_vm5 = vcmp.ge.f32.partialorder %v1391_v36, 0.0  ;;  %v1505_v39 = vmul.f32 0.2, %v1391_v36 }
 0x1d9   :  { %v2031_v11 = vpop.eup %2030 }
 0x1da   :  { %v1525_v40 = vsel %vm1485_vm5, %v1391_v36, %v1505_v39  ;;  %v1726_v41 = vadd.f32 -1.0, %v2031_v11  ;;  %v1370_v49 = vsub.f32 1.0, %v2031_v11 }
 0x1db   :  { %1545 = vst [vmem:[#allocation9 + $0x90] sm:$0xff] %v1525_v40 }
 0x1dc   :  { %v2033_v44 = vpop.eup %2032  ;;  %v1390_v15 = vsel %vm1187_vm14, %v1726_v41, %v1370_v49 }
 0x1dd   :  { %v1747_v19 = vpack.c.bf16 %v1390_v15, %v1389_v6  ;;  %vm1484_vm6 = vcmp.ge.f32.partialorder %v1390_v15, 0.0  ;;  %v1504_v22 = vmul.f32 0.2, %v1390_v15  ;;  %v1728_v46 = vadd.f32 -1.0, %v2033_v44 }
 0x1de   :  { %v1372_v20 = vsub.f32 1.0, %v2033_v44 }
 0x1df   :  { %1465 = vst [vmem:[#allocation8 + $0x40] sm:$0xff] %v1747_v19  ;;  %v1524_v14 = vsel %vm1484_vm6, %v1390_v15, %v1504_v22 }
 0x1e0   :  { %1544 = vst [vmem:[#allocation9 + $0x88] sm:$0xff] %v1524_v14  ;;  %v1392_v50 = vsel %vm1189_vm15, %v1728_v46, %v1372_v20 }
 0x1e1   :  { %v1748_v55 = vpack.c.bf16 %v1392_v50, %v1391_v36  ;;  %vm1486_vm7 = vcmp.ge.f32.partialorder %v1392_v50, 0.0  ;;  %v1506_v58 = vmul.f32 0.2, %v1392_v50 }
 0x1e3   :  { %1466 = vst [vmem:[#allocation8 + $0x48] sm:$0xff] %v1748_v55  ;;  %v1526_v45 = vsel %vm1486_vm7, %v1392_v50, %v1506_v58 }
 0x1e4   :  { %1546 = vst [vmem:[#allocation9 + $0x98] sm:$0xff] %v1526_v45 }
 0x1e5   :  { %2111 = shalt.err (!%p2108_p0)
}
 0x1e6   :  { %s2112_s9 = scalar_lea.hbm %s2587_s3, 1280 }
 0x1e7   :  { %p2113_p1 = scmp.ne.s32.totalorder %s2587_s3, %s2112_s9  ;;  %p2116_p2 = scmp.lt.u32.totalorder %s2112_s9, %s2587_s3 }
 0x1e9   :  { %p2118_p3 = pnand %p2116_p2, %p2113_p1 }
 0x1eb   :  { %2121 = shalt.err (!%p2118_p3)
}
 0x1ec   :  { %1558 = dma.vmem_to_hbm [thread:$0]  %s1553_s29, 1280, %s2587_s3, [#allocation4], %s2153_s25, %s2153_s25, %s2154_s26  }
 0x1ed   :  { %s2122_s17 = scalar_lea.vmem %s2547_s5, 2560  ;;  %p2127_p5 = scmp.lt.s32.totalorder %s2547_s5, %s2547_s5 }
 0x1ee   :  { %p2123_p4 = scmp.ne.s32.totalorder %s2547_s5, %s2122_s17  ;;  %p2128_p6 = scmp.lt.s32.totalorder %s2122_s17, %s2122_s17 }
 0x1f0   :  { %p2129_p7 = por %p2128_p6, %p2127_p5 }
 0x1f2   :  { %p2130_p8 = pnand %p2129_p7, %p2123_p4 }
 0x1f4   :  { %2133 = shalt.err (!%p2130_p8)
}
 0x1f5   :  { %s2134_s20 = scalar_lea.hbm %s2588_s4, 2560 }
 0x1f6   :  { %p2135_p9 = scmp.ne.s32.totalorder %s2588_s4, %s2134_s20  ;;  %p2138_p10 = scmp.lt.u32.totalorder %s2134_s20, %s2588_s4 }
 0x1f8   :  { %p2140_p11 = pnand %p2138_p10, %p2135_p9 }
 0x1fa   :  { %2143 = shalt.err (!%p2140_p11)
}
 0x1fb   :  { %1570 = dma.vmem_to_hbm [thread:$0]  %s2547_s5, 2560, %s2588_s4, [#allocation10], %s2156_s1, %s2156_s1, %s2157_s13  }
 0x1fc   :  { %2148 = dma.done.wait [#allocation4], 1280  }
 0x1fd   :  { %2149 = vsyncadd [#allocation4], 4294966016 }
 0x1fe   :  { %2150 = dma.done.wait [#allocation10], 2560  }
 0x1ff   :  { %2151 = vsyncadd [#allocation10], 4294964736 }
 0x200   :  { %1577 = vsyncpa [#allocation3], 1 }
 0x201   :  { %1578 = vsyncpa [#allocation6], 1 }
 0x202   :  { %1579 = vsyncpa [#allocation4], 1 }
 0x203   :  { %1580 = vsyncpa [#allocation10], 1 }

</bundles_post_ra>
